<compile_context>
chip_gen: v6e
topology: v6e:2x2x1
jax: 0.10.0
libtpu: 0.0.40
codegen_flags: <defaults>
</compile_context>

<pallas_src>
import functools
import math

import jax
import jax.numpy as jnp
from jax.experimental import pallas as pl
from jax.experimental.pallas import tpu as pltpu


# ----------------------------------------------------------------------------
# Pallas kernels
# ----------------------------------------------------------------------------

def _gate_kernel(x_ref, w1_ref, b1_ref, w2_ref, b2_ref, scale_ref,
                 sum_acc, max_acc, *, inv_hw, use_avg, use_max):
    """Global avg/max pool over spatial tiles + shared MLP + sigmoid.

    x_ref:    (N, C, t) spatial tile (NCHW flattened, spatial = lane dim).
    w1_ref:   (C, Cr) f32, b1_ref: (1, Cr) f32
    w2_ref:   (Cr, C) f32, b2_ref: (1, C) f32
    scale_ref:(N, C) f32 output (sigmoid of summed channel attention).
    """
    k = pl.program_id(0)

    @pl.when(k == 0)
    def _init():
        if use_avg:
            sum_acc[...] = jnp.zeros_like(sum_acc)
        if use_max:
            max_acc[...] = jnp.full_like(max_acc, -jnp.inf)

    x = x_ref[...].astype(jnp.float32)                       # (N, C, t)
    if use_avg:
        sum_acc[...] = sum_acc[...] + jnp.sum(x, axis=-1)    # (N, C)
    if use_max:
        max_acc[...] = jnp.maximum(max_acc[...], jnp.max(x, axis=-1))

    @pl.when(k == pl.num_programs(0) - 1)
    def _finalize():
        def mlp(v):
            # tiny (N,C)@(C,Cr) / (N,Cr)@(Cr,C) matmuls -> f32 on the MXU
            h = jnp.dot(v, w1_ref[...], preferred_element_type=jnp.float32)
            h = jnp.maximum(h + b1_ref[...], 0.0)
            o = jnp.dot(h, w2_ref[...], preferred_element_type=jnp.float32)
            return o + b2_ref[...]

        att = None
        if use_avg:
            att = mlp(sum_acc[...] * inv_hw)
        if use_max:
            m = mlp(max_acc[...])
            att = m if att is None else att + m
        # sigmoid (EUP exp + VPU), f32
        scale_ref[...] = 1.0 / (1.0 + jnp.exp(-att))


def _apply_gate_kernel(x_ref, s_ref, o_ref):
    """o = x * scale; scale (1, C, 1) broadcast across the spatial lane dim."""
    o_ref[...] = x_ref[...] * s_ref[...]


# ----------------------------------------------------------------------------
# Wrapper
# ----------------------------------------------------------------------------

def _pick_spatial_tile(hw, bytes_per_pos, vmem_budget=4 << 20):
    """Largest multiple-of-128 divisor of hw whose block fits the budget.

    Falls back to the full extent (always a legal block size)."""
    for t in (4096, 2048, 1024, 512, 384, 256, 128):
        if hw % t == 0 and t * bytes_per_pos <= vmem_budget:
            return t
    return hw


def channel_gate(x_nchw, w1, b1, w2, b2, pool_types=('avg', 'max')):
    """PyTorch ChannelGate forward.

    x_nchw: (N, C, H, W) f32
    w1: (C, C//r), b1: (C//r,)   -- first Linear  (Flatten -> Linear -> ReLU)
    w2: (C//r, C), b2: (C,)      -- second Linear
    returns (N, C, H, W) f32 = x * sigmoid(sum_over_pools mlp(pool(x)))
    """
    use_avg = 'avg' in pool_types
    use_max = 'max' in pool_types
    assert use_avg or use_max, "at least one pool type required"

    N, C, H, W = x_nchw.shape
    HW = H * W
    Cr = w1.shape[1]

    # Free reshape (contiguous): keep the native NCHW layout, spatial = lanes.
    x = x_nchw.reshape(N, C, HW).astype(jnp.float32)

    # --- kernel 1: pooling + MLP + sigmoid ----------------------------------
    t = _pick_spatial_tile(HW, bytes_per_pos=N * C * 4)
    gate_kernel = functools.partial(
        _gate_kernel, inv_hw=1.0 / float(HW), use_avg=use_avg, use_max=use_max)

    scale = pl.pallas_call(
        gate_kernel,
        grid=(HW // t,),
        in_specs=[
            pl.BlockSpec((N, C, t), lambda k: (0, 0, k)),    # x spatial tile
            pl.BlockSpec((C, Cr), lambda k: (0, 0)),         # w1 (VMEM-resident)
            pl.BlockSpec((1, Cr), lambda k: (0, 0)),         # b1
            pl.BlockSpec((Cr, C), lambda k: (0, 0)),         # w2
            pl.BlockSpec((1, C), lambda k: (0, 0)),          # b2
        ],
        out_specs=pl.BlockSpec((N, C), lambda k: (0, 0)),    # resident output
        out_shape=jax.ShapeDtypeStruct((N, C), jnp.float32),
        scratch_shapes=[pltpu.VMEM((N, C), jnp.float32),     # avg-sum accumulator
                        pltpu.VMEM((N, C), jnp.float32)],    # running max
        compiler_params=pltpu.CompilerParams(
            dimension_semantics=("arbitrary",)),             # spatial reduction axis
    )(x,
      w1.astype(jnp.float32), b1.reshape(1, Cr).astype(jnp.float32),
      w2.astype(jnp.float32), b2.reshape(1, C).astype(jnp.float32))

    # --- kernel 2: apply the gate (broadcast multiply) ----------------------
    tb = _pick_spatial_tile(HW, bytes_per_pos=2 * C * 4)
    out = pl.pallas_call(
        _apply_gate_kernel,
        grid=(N, HW // tb),
        in_specs=[
            pl.BlockSpec((1, C, tb), lambda n, k: (n, 0, k)),
            pl.BlockSpec((1, C, 1), lambda n, k: (n, 0, 0)),
        ],
        out_specs=pl.BlockSpec((1, C, tb), lambda n, k: (n, 0, k)),
        out_shape=jax.ShapeDtypeStruct((N, C, HW), jnp.float32),
        compiler_params=pltpu.CompilerParams(
            dimension_semantics=("parallel", "parallel")),   # both TCs on v7x
    )(x, scale.reshape(N, C, 1))

    return out.reshape(N, C, H, W)


# ----------------------------------------------------------------------------
# Pure-JAX reference (matches the PyTorch module, f32 end to end)
# ----------------------------------------------------------------------------

def channel_gate_ref(x, w1, b1, w2, b2, pool_types=('avg', 'max')):
    def mlp(v):
        h = jnp.maximum(v @ w1 + b1, 0.0)
        return h @ w2 + b2

    att = None
    if 'avg' in pool_types:
        att = mlp(jnp.mean(x, axis=(2, 3)))
    if 'max' in pool_types:
        m = mlp(jnp.max(x, axis=(2, 3)))
        att = m if att is None else att + m
    s = jax.nn.sigmoid(att)
    return x * s[:, :, None, None]


# ----------------------------------------------------------------------------
# Main
# ----------------------------------------------------------------------------

if __name__ == "__main__":
    key = jax.random.PRNGKey(0)
    k1, k2, k3, k4, k5 = jax.random.split(key, 5)

    # gate_channels=64, reduction_ratio=16 (PyTorch defaults), small spatial
    N, C, H, W = 2, 64, 16, 16
    reduction = 16
    Cr = C // reduction

    x = jax.random.uniform(k1, (N, C, H, W), jnp.float32)
    w1 = jax.random.normal(k2, (C, Cr), jnp.float32) / math.sqrt(C)
    b1 = 0.1 * jax.random.normal(k3, (Cr,), jnp.float32)
    w2 = jax.random.normal(k4, (Cr, C), jnp.float32) / math.sqrt(Cr)
    b2 = 0.1 * jax.random.normal(k5, (C,), jnp.float32)

    out = channel_gate(x, w1, b1, w2, b2)
    jax.block_until_ready(out)

    ref = channel_gate_ref(x, w1, b1, w2, b2)
    assert out.shape == x.shape, (out.shape, x.shape)
    max_err = float(jnp.max(jnp.abs(out - ref)))
    assert max_err < 2e-3, f"max abs error vs reference: {max_err}"

    print("KERNEL_OK")
</pallas_src>

<mosaic_0001>
module attributes {stable_mosaic.version = 11 : i64} {
  func.func @_gate_kernel(%arg0: i32, %arg1: memref<2x64x256xf32, #tpu.memory_space<vmem>>, %arg2: memref<64x4xf32, #tpu.memory_space<vmem>>, %arg3: memref<1x4xf32, #tpu.memory_space<vmem>>, %arg4: memref<4x64xf32, #tpu.memory_space<vmem>>, %arg5: memref<1x64xf32, #tpu.memory_space<vmem>>, %arg6: memref<2x64xf32, #tpu.memory_space<vmem>>, %arg7: memref<2x64xf32, #tpu.memory_space<vmem>>, %arg8: memref<2x64xf32, #tpu.memory_space<vmem>>) attributes {dimension_semantics = [#tpu.dimension_semantics<arbitrary>], iteration_bounds = array<i64: 1>, scalar_prefetch = 0 : i64, scratch_operands = 2 : i64, tpu.core_type = #tpu.core_type<tc>, window_params = [{transform_indices = @transform_0, window_bounds = array<i64: 2, 64, 256>}, {pipeline_mode = #tpu.pipeline_mode<synchronous>, transform_indices = @transform_1, window_bounds = array<i64: 64, 4>}, {pipeline_mode = #tpu.pipeline_mode<synchronous>, transform_indices = @transform_2, window_bounds = array<i64: 1, 4>}, {pipeline_mode = #tpu.pipeline_mode<synchronous>, transform_indices = @transform_3, window_bounds = array<i64: 4, 64>}, {pipeline_mode = #tpu.pipeline_mode<synchronous>, transform_indices = @transform_4, window_bounds = array<i64: 1, 64>}, {pipeline_mode = #tpu.pipeline_mode<synchronous>, transform_indices = @transform_5, window_bounds = array<i64: 2, 64>}]} {
    %c0_i32 = arith.constant 0 : i32
    %0 = arith.cmpi eq, %arg0, %c0_i32 : i32
    %1 = arith.extui %0 : i1 to i32
    %c0_i32_0 = arith.constant 0 : i32
    %2 = arith.cmpi ne, %1, %c0_i32_0 : i32
    scf.if %2 {
      %cst_14 = arith.constant 0.000000e+00 : f32
      %15 = vector.broadcast %cst_14 : f32 to vector<2x64xf32>
      %c0_15 = arith.constant 0 : index
      %c0_16 = arith.constant 0 : index
      %16 = vector.load %arg7[%c0_15, %c0_16] : memref<2x64xf32, #tpu.memory_space<vmem>>, vector<2x64xf32>
      tpu.vector_store %arg7[%c0_15, %c0_16], %15 {strides = array<i32>} : memref<2x64xf32, #tpu.memory_space<vmem>>, vector<2x64xf32>,
      %cst_17 = arith.constant 0xFF800000 : f32
      %17 = vector.broadcast %cst_17 : f32 to vector<2x64xf32>
      %c0_18 = arith.constant 0 : index
      %c0_19 = arith.constant 0 : index
      %18 = vector.load %arg8[%c0_18, %c0_19] : memref<2x64xf32, #tpu.memory_space<vmem>>, vector<2x64xf32>
      tpu.vector_store %arg8[%c0_18, %c0_19], %17 {strides = array<i32>} : memref<2x64xf32, #tpu.memory_space<vmem>>, vector<2x64xf32>,
    } else {
    }
    %c0 = arith.constant 0 : index
    %c0_1 = arith.constant 0 : index
    %c0_2 = arith.constant 0 : index
    %3 = vector.load %arg1[%c0, %c0_1, %c0_2] : memref<2x64x256xf32, #tpu.memory_space<vmem>>, vector<2x64x256xf32>
    %c0_3 = arith.constant 0 : index
    %c0_4 = arith.constant 0 : index
    %4 = vector.load %arg7[%c0_3, %c0_4] : memref<2x64xf32, #tpu.memory_space<vmem>>, vector<2x64xf32>
    %cst = arith.constant dense<0.000000e+00> : vector<2x64xf32>
    %5 = vector.multi_reduction <add>, %3, %cst [2] : vector<2x64x256xf32> to vector<2x64xf32>
    %6 = arith.addf %4, %5 : vector<2x64xf32>
    %c0_5 = arith.constant 0 : index
    %c0_6 = arith.constant 0 : index
    %7 = vector.load %arg7[%c0_5, %c0_6] : memref<2x64xf32, #tpu.memory_space<vmem>>, vector<2x64xf32>
    tpu.vector_store %arg7[%c0_5, %c0_6], %6 {strides = array<i32>} : memref<2x64xf32, #tpu.memory_space<vmem>>, vector<2x64xf32>,
    %c0_7 = arith.constant 0 : index
    %c0_8 = arith.constant 0 : index
    %8 = vector.load %arg8[%c0_7, %c0_8] : memref<2x64xf32, #tpu.memory_space<vmem>>, vector<2x64xf32>
    %cst_9 = arith.constant dense<0xFF800000> : vector<2x64xf32>
    %9 = vector.multi_reduction <maximumf>, %3, %cst_9 [2] : vector<2x64x256xf32> to vector<2x64xf32>
    %10 = arith.maximumf %8, %9 : vector<2x64xf32>
    %c0_10 = arith.constant 0 : index
    %c0_11 = arith.constant 0 : index
    %11 = vector.load %arg8[%c0_10, %c0_11] : memref<2x64xf32, #tpu.memory_space<vmem>>, vector<2x64xf32>
    tpu.vector_store %arg8[%c0_10, %c0_11], %10 {strides = array<i32>} : memref<2x64xf32, #tpu.memory_space<vmem>>, vector<2x64xf32>,
    %c0_i32_12 = arith.constant 0 : i32
    %12 = arith.cmpi eq, %arg0, %c0_i32_12 : i32
    %13 = arith.extui %12 : i1 to i32
    %c0_i32_13 = arith.constant 0 : i32
    %14 = arith.cmpi ne, %13, %c0_i32_13 : i32
    scf.if %14 {
      %c0_14 = arith.constant 0 : index
      %c0_15 = arith.constant 0 : index
      %15 = vector.load %arg7[%c0_14, %c0_15] : memref<2x64xf32, #tpu.memory_space<vmem>>, vector<2x64xf32>
      %cst_16 = arith.constant 3.906250e-03 : f32
      %16 = vector.broadcast %cst_16 : f32 to vector<2x64xf32>
      %17 = arith.mulf %15, %16 : vector<2x64xf32>
      %c0_17 = arith.constant 0 : index
      %c0_18 = arith.constant 0 : index
      %18 = vector.load %arg2[%c0_17, %c0_18] : memref<64x4xf32, #tpu.memory_space<vmem>>, vector<64x4xf32>
      %cst_19 = arith.constant dense<0.000000e+00> : vector<2x4xf32>
      %19 = tpu.matmul %17, %18, %cst_19 {dimension_numbers = #tpu.dot_dimension_numbers<[1], [0], [0], [1], [0, 0, 1, 1], [], []>} : vector<2x64xf32>, vector<64x4xf32>, vector<2x4xf32> -> vector<2x4xf32>
      %c0_20 = arith.constant 0 : index
      %c0_21 = arith.constant 0 : index
      %20 = vector.load %arg3[%c0_20, %c0_21] : memref<1x4xf32, #tpu.memory_space<vmem>>, vector<1x4xf32>
      %21 = vector.broadcast %20 : vector<1x4xf32> to vector<2x4xf32>
      %22 = arith.addf %19, %21 : vector<2x4xf32>
      %cst_22 = arith.constant 0.000000e+00 : f32
      %23 = vector.broadcast %cst_22 : f32 to vector<2x4xf32>
      %24 = arith.maximumf %22, %23 : vector<2x4xf32>
      %c0_23 = arith.constant 0 : index
      %c0_24 = arith.constant 0 : index
      %25 = vector.load %arg4[%c0_23, %c0_24] : memref<4x64xf32, #tpu.memory_space<vmem>>, vector<4x64xf32>
      %cst_25 = arith.constant dense<0.000000e+00> : vector<2x64xf32>
      %26 = tpu.matmul %24, %25, %cst_25 {dimension_numbers = #tpu.dot_dimension_numbers<[1], [0], [0], [1], [0, 0, 1, 1], [], []>} : vector<2x4xf32>, vector<4x64xf32>, vector<2x64xf32> -> vector<2x64xf32>
      %c0_26 = arith.constant 0 : index
      %c0_27 = arith.constant 0 : index
      %27 = vector.load %arg5[%c0_26, %c0_27] : memref<1x64xf32, #tpu.memory_space<vmem>>, vector<1x64xf32>
      %28 = vector.broadcast %27 : vector<1x64xf32> to vector<2x64xf32>
      %29 = arith.addf %26, %28 : vector<2x64xf32>
      %c0_28 = arith.constant 0 : index
      %c0_29 = arith.constant 0 : index
      %30 = vector.load %arg8[%c0_28, %c0_29] : memref<2x64xf32, #tpu.memory_space<vmem>>, vector<2x64xf32>
      %c0_30 = arith.constant 0 : index
      %c0_31 = arith.constant 0 : index
      %31 = vector.load %arg2[%c0_30, %c0_31] : memref<64x4xf32, #tpu.memory_space<vmem>>, vector<64x4xf32>
      %cst_32 = arith.constant dense<0.000000e+00> : vector<2x4xf32>
      %32 = tpu.matmul %30, %31, %cst_32 {dimension_numbers = #tpu.dot_dimension_numbers<[1], [0], [0], [1], [0, 0, 1, 1], [], []>} : vector<2x64xf32>, vector<64x4xf32>, vector<2x4xf32> -> vector<2x4xf32>
      %c0_33 = arith.constant 0 : index
      %c0_34 = arith.constant 0 : index
      %33 = vector.load %arg3[%c0_33, %c0_34] : memref<1x4xf32, #tpu.memory_space<vmem>>, vector<1x4xf32>
      %34 = vector.broadcast %33 : vector<1x4xf32> to vector<2x4xf32>
      %35 = arith.addf %32, %34 : vector<2x4xf32>
      %cst_35 = arith.constant 0.000000e+00 : f32
      %36 = vector.broadcast %cst_35 : f32 to vector<2x4xf32>
      %37 = arith.maximumf %35, %36 : vector<2x4xf32>
      %c0_36 = arith.constant 0 : index
      %c0_37 = arith.constant 0 : index
      %38 = vector.load %arg4[%c0_36, %c0_37] : memref<4x64xf32, #tpu.memory_space<vmem>>, vector<4x64xf32>
      %cst_38 = arith.constant dense<0.000000e+00> : vector<2x64xf32>
      %39 = tpu.matmul %37, %38, %cst_38 {dimension_numbers = #tpu.dot_dimension_numbers<[1], [0], [0], [1], [0, 0, 1, 1], [], []>} : vector<2x4xf32>, vector<4x64xf32>, vector<2x64xf32> -> vector<2x64xf32>
      %c0_39 = arith.constant 0 : index
      %c0_40 = arith.constant 0 : index
      %40 = vector.load %arg5[%c0_39, %c0_40] : memref<1x64xf32, #tpu.memory_space<vmem>>, vector<1x64xf32>
      %41 = vector.broadcast %40 : vector<1x64xf32> to vector<2x64xf32>
      %42 = arith.addf %39, %41 : vector<2x64xf32>
      %43 = arith.addf %29, %42 : vector<2x64xf32>
      %cst_41 = arith.constant 0.000000e+00 : f32
      %44 = vector.broadcast %cst_41 : f32 to vector<2x64xf32>
      %45 = arith.subf %44, %43 : vector<2x64xf32>
      %46 = math.exp %45 : vector<2x64xf32>
      %cst_42 = arith.constant 1.000000e+00 : f32
      %47 = vector.broadcast %cst_42 : f32 to vector<2x64xf32>
      %48 = arith.addf %47, %46 : vector<2x64xf32>
      %cst_43 = arith.constant 1.000000e+00 : f32
      %49 = vector.broadcast %cst_43 : f32 to vector<2x64xf32>
      %50 = arith.divf %49, %48 : vector<2x64xf32>
      %c0_44 = arith.constant 0 : index
      %c0_45 = arith.constant 0 : index
      %51 = vector.load %arg6[%c0_44, %c0_45] : memref<2x64xf32, #tpu.memory_space<vmem>>, vector<2x64xf32>
      tpu.vector_store %arg6[%c0_44, %c0_45], %50 {strides = array<i32>} : memref<2x64xf32, #tpu.memory_space<vmem>>, vector<2x64xf32>,
    } else {
    }
    return
  }
  func.func @transform_0(%arg0: i32) -> (i32, i32, i32) {
    %c0_i32 = arith.constant 0 : i32
    %c0_i32_0 = arith.constant 0 : i32
    %c0_i32_1 = arith.constant 0 : i32
    return %c0_i32, %c0_i32_0, %arg0 : i32, i32, i32
  }
  func.func @transform_1(%arg0: i32) -> (i32, i32) {
    %c0_i32 = arith.constant 0 : i32
    %c0_i32_0 = arith.constant 0 : i32
    %c0_i32_1 = arith.constant 0 : i32
    return %c0_i32, %c0_i32_0 : i32, i32
  }
  func.func @transform_2(%arg0: i32) -> (i32, i32) {
    %c0_i32 = arith.constant 0 : i32
    %c0_i32_0 = arith.constant 0 : i32
    %c0_i32_1 = arith.constant 0 : i32
    return %c0_i32, %c0_i32_0 : i32, i32
  }
  func.func @transform_3(%arg0: i32) -> (i32, i32) {
    %c0_i32 = arith.constant 0 : i32
    %c0_i32_0 = arith.constant 0 : i32
    %c0_i32_1 = arith.constant 0 : i32
    return %c0_i32, %c0_i32_0 : i32, i32
  }
  func.func @transform_4(%arg0: i32) -> (i32, i32) {
    %c0_i32 = arith.constant 0 : i32
    %c0_i32_0 = arith.constant 0 : i32
    %c0_i32_1 = arith.constant 0 : i32
    return %c0_i32, %c0_i32_0 : i32, i32
  }
  func.func @transform_5(%arg0: i32) -> (i32, i32) {
    %c0_i32 = arith.constant 0 : i32
    %c0_i32_0 = arith.constant 0 : i32
    %c0_i32_1 = arith.constant 0 : i32
    return %c0_i32, %c0_i32_0 : i32, i32
  }
}

</mosaic_0001>

<bundles_post_ra>
// kernel: tpu_custom_call.1
= control target key start
LH: loop header
LB: loop body
LE: loop exit
PB: predicated region body
PF: predicated region fallthrough
CT: control target
= control target key end

     0   :  { %10 = vsyncpa [#allocation5], 0  ;;  %s1221_s0 = inlined_call_operand.hbm [shape: f32[2,64,256], index: 0, kind: input, shape index: {}]   ;;  %s1222_s1 = inlined_call_operand.vmem [shape: f32[64,4], index: 1, kind: input, shape index: {}]   ;;  %s1223_s2 = inlined_call_operand.vmem [shape: f32[1,4], index: 2, kind: input, shape index: {}]   ;;  %s1224_s3 = inlined_call_operand.vmem [shape: f32[4,64], index: 3, kind: input, shape index: {}]   ;;  %s1225_s4 = inlined_call_operand.vmem [shape: f32[1,64], index: 4, kind: input, shape index: {}]   ;;  %s1226_s5 = inlined_call_operand.hbm [shape: f32[2,64], index: 5, kind: output, shape index: {}]  }
   0x1   :  { %11 = vsyncpa [#allocation6], 0  ;;  %s871_s18 = smov [#allocation4]  }
   0x2   :  { %s17_s19 = sshll.u32 %s871_s18, 4  ;;  %s18_s19 = int_to_ptr.vmem [resolvable:$true] %s17_s19 }
   0x3   :  { %s835_s20 = scalar_lea.vmem %s18_s19, 4096  ;;  %p840_p1 = scmp.lt.s32.totalorder %s18_s19, %s18_s19 }
   0x4   :  { %p836_p0 = scmp.ne.s32.totalorder %s18_s19, %s835_s20  ;;  %p841_p2 = scmp.lt.s32.totalorder %s835_s20, %s835_s20 }
   0x6   :  { %p842_p3 = por %p841_p2, %p840_p1 }
   0x8   :  { %p843_p4 = pnand %p842_p3, %p836_p0 }
   0xa   :  { %846 = shalt.err (!%p843_p4)
}
   0xb   :  { %s872_s21 = smov 256   ;;  %s873_s22 = smov 16  }
   0xc   :  { %23 = dma.hbm_to_vmem [thread:$0]  %s1221_s0, 4096, %s18_s19, [#allocation5], %s872_s21, %s872_s21, %s873_s22  }
   0xd   :  { %867 = dma.done.wait [#allocation5], 4096  }
   0xe   :  { %868 = vsyncadd [#allocation5], 4294963200  ;;  %v911_v0 = vld [vmem:[#allocation4 + $0x80] sm:$0xff]  ;;  %v913_v1 = vld [vmem:[#allocation4 + $0x88] sm:$0xff]  ;;  %vm39_vm0 = vcmask 517120   ;;  %v874_v48 = vmov 0.0  }
   0xf   :  { %v915_v2 = vld [vmem:[#allocation4] sm:$0xff]  ;;  %v99_v3 = vadd.f32 %v913_v1, %v911_v0  ;;  %v919_v4 = vld [vmem:[#allocation4 + $0x8] sm:$0xff]  ;;  %v921_v5 = vld [vmem:[#allocation4 + $0x90] sm:$0xff]  ;;  %40 = vst.msk [vmem:[#allocation2] sm:$0x3] %vm39_vm0, %v874_v48  ;;  %768 = vmatprep.subr.mxu0 %v874_v48  ;;  %787 = vmatprep.subr.mxu1 %v874_v48  ;;  %vm875_vm1 = vmmov 0   ;;  %v264_v60 = vmax.f32 %v911_v0, %v913_v1 }
  0x10   :  { %v923_v6 = vld [vmem:[#allocation4 + $0x98] sm:$0xff]  ;;  %v75_v7 = vadd.f32 %v919_v4, %v915_v2  ;;  %v927_v8 = vld [vmem:[#allocation4 + $0x10] sm:$0xff]  ;;  %v935_v12 = vld [vmem:[#allocation4 + $0xa0] sm:$0xff]  ;;  %784 = vmatprep.mubr.msk.f32.mxu0 %vm875_vm1, %v874_v48  ;;  %789 = vmatprep.mubr.msk.f32.mxu1 %vm875_vm1, %v874_v48  ;;  %v240_v58 = vmax.f32 %v915_v2, %v919_v4  ;;  %vm150_vm2 = vcmask 130112   ;;  %vm157_vm3 = vcmask 195712   ;;  %s877_s18 = smov [#allocation7]  }
  0x11   :  { %v929_v9 = vld [vmem:[#allocation4 + $0x18] sm:$0xff]  ;;  %100 = vadd.xlane.f32.xlu1 %v99_v3  ;;  %v102_v10 = vadd.f32 %v923_v6, %v921_v5  ;;  %v937_v13 = vld [vmem:[#allocation4 + $0xa8] sm:$0xff]  ;;  %v939_v14 = vld [vmem:[#allocation4 + $0x20] sm:$0xff]  ;;  %v267_v59 = vmax.f32 %v921_v5, %v923_v6  ;;  %vm164_vm4 = vcmask 261312   ;;  %vm171_vm5 = vcmask 326912   ;;  %s729_s19 = sshll.u32 %s877_s18, 4  ;;  %s730_s19 = int_to_ptr.vmem [resolvable:$true] %s729_s19 }
  0x12   :  { %76 = vadd.xlane.f32.xlu0 %v75_v7  ;;  %v78_v11 = vadd.f32 %v929_v9, %v927_v8  ;;  %v941_v15 = vld [vmem:[#allocation4 + $0x28] sm:$0xff]  ;;  %v105_v16 = vadd.f32 %v937_v13, %v935_v12  ;;  %v947_v18 = vld [vmem:[#allocation4 + $0xb0] sm:$0xff]  ;;  %v949_v19 = vld [vmem:[#allocation4 + $0xb8] sm:$0xff]  ;;  %v243_v57 = vmax.f32 %v927_v8, %v929_v9  ;;  %v270_v61 = vmax.f32 %v935_v12, %v937_v13  ;;  %s847_s20 = scalar_lea.vmem %s730_s19, 32  ;;  %p852_p6 = scmp.lt.s32.totalorder %s730_s19, %s730_s19 }
  0x13   :  { %v81_v17 = vadd.f32 %v941_v15, %v939_v14  ;;  %v951_v20 = vld [vmem:[#allocation4 + $0x30] sm:$0xff]  ;;  %v953_v21 = vld [vmem:[#allocation4 + $0x38] sm:$0xff]  ;;  %v108_v22 = vadd.f32 %v949_v19, %v947_v18  ;;  %v959_v24 = vld [vmem:[#allocation4 + $0xc0] sm:$0xff]  ;;  %v246_v62 = vmax.f32 %v939_v14, %v941_v15  ;;  %v273_v63 = vmax.f32 %v947_v18, %v949_v19  ;;  %p848_p5 = scmp.ne.s32.totalorder %s730_s19, %s847_s20  ;;  %p853_p7 = scmp.lt.s32.totalorder %s847_s20, %s847_s20 }
  0x14   :  { %v84_v23 = vadd.f32 %v953_v21, %v951_v20  ;;  %v961_v25 = vld [vmem:[#allocation4 + $0xc8] sm:$0xff]  ;;  %v963_v26 = vld [vmem:[#allocation4 + $0x40] sm:$0xff]  ;;  %v971_v30 = vld [vmem:[#allocation4 + $0xd0] sm:$0xff]  ;;  %v249_v2 = vmax.f32 %v951_v20, %v953_v21  ;;  %v876_v9 = vmov -inf   ;;  %v139_v14 = vlaneseq }
  0x15   :  { %103 = vadd.xlane.f32.xlu1 %v102_v10  ;;  %v965_v27 = vld [vmem:[#allocation4 + $0x48] sm:$0xff]  ;;  %v111_v28 = vadd.f32 %v961_v25, %v959_v24  ;;  %v973_v31 = vld [vmem:[#allocation4 + $0xd8] sm:$0xff]  ;;  %v975_v32 = vld [vmem:[#allocation4 + $0x50] sm:$0xff]  ;;  %v276_v0 = vmax.f32 %v959_v24, %v961_v25  ;;  %41 = vst.msk [vmem:[#allocation3] sm:$0x3] %vm39_vm0, %v876_v9  ;;  %vm178_vm6 = vcmask 392512   ;;  %p854_p8 = por %p853_p7, %p852_p6 }
  0x16   :  { %79 = vadd.xlane.f32.xlu0 %v78_v11  ;;  %v87_v29 = vadd.f32 %v965_v27, %v963_v26  ;;  %v977_v33 = vld [vmem:[#allocation4 + $0x58] sm:$0xff]  ;;  %v114_v34 = vadd.f32 %v973_v31, %v971_v30  ;;  %v983_v36 = vld [vmem:[#allocation4 + $0xe0] sm:$0xff]  ;;  %v985_v37 = vld [vmem:[#allocation4 + $0xe8] sm:$0xff]  ;;  %v252_v1 = vmax.f32 %v963_v26, %v965_v27  ;;  %v279_v3 = vmax.f32 %v971_v30, %v973_v31 }
  0x17   :  { %v90_v35 = vadd.f32 %v977_v33, %v975_v32  ;;  %v987_v38 = vld [vmem:[#allocation4 + $0x60] sm:$0xff]  ;;  %v989_v39 = vld [vmem:[#allocation4 + $0x68] sm:$0xff]  ;;  %v117_v40 = vadd.f32 %v985_v37, %v983_v36  ;;  %v995_v42 = vld [vmem:[#allocation4 + $0xf0] sm:$0xff]  ;;  %v255_v4 = vmax.f32 %v975_v32, %v977_v33  ;;  %v282_v5 = vmax.f32 %v983_v36, %v985_v37  ;;  %p855_p9 = pnand %p854_p8, %p848_p5 }
  0x18   :  { %v93_v41 = vadd.f32 %v989_v39, %v987_v38  ;;  %v997_v43 = vld [vmem:[#allocation4 + $0xf8] sm:$0xff]  ;;  %v999_v44 = vld [vmem:[#allocation4 + $0x70] sm:$0xff]  ;;  %v1028_v51 = vld [vmem:[%s1222_s1 + $0x28] sm:$0xff]  ;;  %v258_v6 = vmax.f32 %v987_v38, %v989_v39  ;;  %vm185_vm7 = vcmask 458112   ;;  %vm192_vm8 = vcmask 523712  }
  0x19   :  { %106 = vadd.xlane.f32.xlu1 %v105_v16  ;;  %v1001_v45 = vld [vmem:[#allocation4 + $0x78] sm:$0xff]  ;;  %v120_v46 = vadd.f32 %v997_v43, %v995_v42  ;;  %v1021_v50 = vld [vmem:[%s1222_s1 + $0x30] sm:$0xff]  ;;  %v1058_v55 = vld [vmem:[%s1222_s1 + $0x8] sm:$0xff]  ;;  %v285_v7 = vmax.f32 %v995_v42, %v997_v43  ;;  %vm233_vm9 = vcmask 1041409   ;;  %vm406_vm10 = vcmask 523264  }
  0x1a   :  { %82 = vadd.xlane.f32.xlu0 %v81_v17  ;;  %v96_v47 = vadd.f32 %v1001_v45, %v999_v44  ;;  %v1014_v49 = vld [vmem:[%s1222_s1 + $0x38] sm:$0xff]  ;;  %v1035_v52 = vld [vmem:[%s1222_s1 + $0x20] sm:$0xff]  ;;  %v1049_v54 = vld [vmem:[%s1222_s1 + $0x10] sm:$0xff]  ;;  %v261_v8 = vmax.f32 %v999_v44, %v1001_v45  ;;  %v140_v17 = vand.u32 127, %v139_v14  ;;  %vm493_vm11 = vcmask 1043456  }
  0x1b   :  { %769 = vmatpush3.msra.mxu0 %v1014_v49  ;;  %v1040_v53 = vld [vmem:[%s1222_s1 + $0x18] sm:$0xff]  ;;  %v1065_v56 = vld [vmem:[%s1222_s1] sm:$0xff]  ;;  %vm489_vm12 = vcmask 31744  }
  0x1c   :  { %770 = vmatprep.subr.mxu0 %v874_v48  ;;  %v145_v19 = vadd.s32 4294967288, %v140_v17  ;;  %v152_v21 = vadd.s32 4294967280, %v140_v17  ;;  %v166_v24 = vadd.s32 4294967264, %v140_v17  ;;  %v180_v30 = vadd.s32 4294967248, %v140_v17 }
  0x1d   :  { %109 = vadd.xlane.f32.xlu1 %v108_v22  ;;  %771 = vmatpush3.msra.mxu0 %v1021_v50  ;;  %v142_v22 = vshrl.u32 %v139_v14, 7  ;;  %v187_v38 = vadd.s32 4294967240, %v140_v17 }
  0x1e   :  { %85 = vadd.xlane.f32.xlu0 %v84_v23  ;;  %772 = vmatprep.subr.mxu0 %v874_v48  ;;  %v159_v23 = vadd.s32 4294967272, %v140_v17 }
  0x1f   :  { %773 = vmatpush3.msra.mxu0 %v1028_v51  ;;  %v1104_v26 = vsub.s32 %v145_v19, %v142_v22  ;;  %v1108_v31 = vsub.s32 %v140_v17, %v142_v22  ;;  %v1112_v33 = vsub.s32 %v166_v24, %v142_v22 }
  0x20   :  { %774 = vmatprep.subr.mxu0 %v874_v48  ;;  %v1110_v32 = vsub.s32 %v159_v23, %v142_v22 }
  0x21   :  { %112 = vadd.xlane.f32.xlu1 %v111_v28  ;;  %775 = vmatpush3.msra.mxu0 %v1035_v52  ;;  %v173_v28 = vadd.s32 4294967256, %v140_v17 }
  0x22   :  { %88 = vadd.xlane.f32.xlu0 %v87_v29  ;;  %776 = vmatprep.subr.mxu0 %v874_v48  ;;  %v1106_v29 = vsub.s32 %v152_v21, %v142_v22 }
  0x23   :  { %777 = vmatpush3.msra.mxu0 %v1040_v53  ;;  %v1115_v36 = vsub.s32 %v173_v28, %v142_v22 }
  0x24   :  { %778 = vmatprep.subr.mxu0 %v874_v48 }
  0x25   :  { %115 = vadd.xlane.f32.xlu1 %v114_v34  ;;  %779 = vmatpush3.msra.mxu0 %v1049_v54 }
  0x26   :  { %91 = vadd.xlane.f32.xlu0 %v90_v35  ;;  %780 = vmatprep.subr.mxu0 %v874_v48 }
  0x27   :  { %781 = vmatpush3.msra.mxu0 %v1058_v55 }
  0x28   :  { %782 = vmatprep.subr.mxu0 %v874_v48 }
  0x29   :  { %118 = vadd.xlane.f32.xlu1 %v117_v40  ;;  %783 = vmatpush3.msra.mxu0 %v1065_v56 }
  0x2a   :  { %94 = vadd.xlane.f32.xlu0 %v93_v41  ;;  %811 = vmatprep.subr.mxu0 %v874_v48  ;;  %v1119_v41 = vsub.s32 %v180_v30, %v142_v22 }
  0x2d   :  { %121 = vadd.xlane.f32.xlu1 %v120_v46 }
  0x2e   :  { %97 = vadd.xlane.f32.xlu0 %v96_v47 }
  0x31   :  { %244 = vmax.xlane.f32.xlu1 %v243_v57 }
  0x32   :  { %241 = vmax.xlane.f32.xlu0 %v240_v58 }
  0x35   :  { %268 = vmax.xlane.f32.xlu1 %v267_v59 }
  0x36   :  { %265 = vmax.xlane.f32.xlu0 %v264_v60 }
  0x39   :  { %271 = vmax.xlane.f32.xlu1 %v270_v61 }
  0x3a   :  { %247 = vmax.xlane.f32.xlu0 %v246_v62  ;;  %v1130_v62 = vsub.s32 %v187_v38, %v142_v22 }
  0x3d   :  { %274 = vmax.xlane.f32.xlu1 %v273_v63 }
  0x3e   :  { %250 = vmax.xlane.f32.xlu0 %v249_v2 }
  0x41   :  { %277 = vmax.xlane.f32.xlu1 %v276_v0 }
  0x42   :  { %253 = vmax.xlane.f32.xlu0 %v252_v1 }
  0x45   :  { %280 = vmax.xlane.f32.xlu1 %v279_v3 }
  0x46   :  { %256 = vmax.xlane.f32.xlu0 %v255_v4 }
  0x49   :  { %283 = vmax.xlane.f32.xlu1 %v282_v5 }
  0x4a   :  { %259 = vmax.xlane.f32.xlu0 %v258_v6 }
  0x4d   :  { %286 = vmax.xlane.f32.xlu1 %v285_v7 }
  0x4e   :  { %262 = vmax.xlane.f32.xlu0 %v261_v8 }
  0x9a   :  { %v101_v10 = vpop.xlane.xlu1 %100 }
  0x9b   :  { %v77_v11 = vpop.xlane.xlu0 %76  ;;  %v197_v42 = vrot.slane %v101_v10, %v1108_v31 }
  0x9c   :  { %v144_v45 = vrot.slane %v77_v11, %v1108_v31 }
  0x9e   :  { %v104_v12 = vpop.xlane.xlu1 %103 }
  0x9f   :  { %v80_v13 = vpop.xlane.xlu0 %79  ;;  %v201_v35 = vrot.slane %v104_v12, %v1104_v26 }
  0xa0   :  { %v149_v39 = vrot.slane %v80_v13, %v1104_v26 }
  0xa1   :  { %v202_v58 = vsel %vm150_vm2, %v201_v35, %v197_v42 }
  0xa2   :  { %v107_v15 = vpop.xlane.xlu1 %106  ;;  %v151_v63 = vsel %vm150_vm2, %v149_v39, %v144_v45 }
  0xa3   :  { %v83_v16 = vpop.xlane.xlu0 %82  ;;  %v206_v40 = vrot.slane %v107_v15, %v1106_v29 }
  0xa4   :  { %v156_v43 = vrot.slane %v83_v16, %v1106_v29 }
  0xa5   :  { %v207_v2 = vsel %vm157_vm3, %v206_v40, %v202_v58 }
  0xa6   :  { %v110_v18 = vpop.xlane.xlu1 %109  ;;  %v158_v3 = vsel %vm157_vm3, %v156_v43, %v151_v63 }
  0xa7   :  { %v86_v20 = vpop.xlane.xlu0 %85  ;;  %v211_v44 = vrot.slane %v110_v18, %v1110_v32  ;;  %v74_v18 = vld [vmem:[#allocation2] sm:$0x3] }
  0xa8   :  { %v163_v46 = vrot.slane %v86_v20, %v1110_v32 }
  0xa9   :  { %v212_v4 = vsel %vm164_vm4, %v211_v44, %v207_v2 }
  0xaa   :  { %v113_v25 = vpop.xlane.xlu1 %112  ;;  %v165_v6 = vsel %vm164_vm4, %v163_v46, %v158_v3 }
  0xab   :  { %v89_v27 = vpop.xlane.xlu0 %88  ;;  %v216_v47 = vrot.slane %v113_v25, %v1112_v33 }
  0xac   :  { %v170_v59 = vrot.slane %v89_v27, %v1112_v33 }
  0xad   :  { %v217_v7 = vsel %vm171_vm5, %v216_v47, %v212_v4 }
  0xae   :  { %v116_v34 = vpop.xlane.xlu1 %115  ;;  %v172_v9 = vsel %vm171_vm5, %v170_v59, %v165_v6 }
  0xaf   :  { %v92_v37 = vpop.xlane.xlu0 %91  ;;  %v221_v60 = vrot.slane %v116_v34, %v1115_v36 }
  0xb0   :  { %v177_v0 = vrot.slane %v92_v37, %v1115_v36 }
  0xb1   :  { %v222_v10 = vsel %vm178_vm6, %v221_v60, %v217_v7 }
  0xb2   :  { %v119_v57 = vpop.xlane.xlu1 %118  ;;  %v179_v13 = vsel %vm178_vm6, %v177_v0, %v172_v9 }
  0xb3   :  { %v95_v61 = vpop.xlane.xlu0 %94  ;;  %v226_v1 = vrot.slane %v119_v57, %v1119_v41 }
  0xb4   :  { %v184_v5 = vrot.slane %v95_v61, %v1119_v41 }
  0xb5   :  { %v227_v14 = vsel %vm185_vm7, %v226_v1, %v222_v10 }
  0xb6   :  { %v122_v8 = vpop.xlane.xlu1 %121  ;;  %v186_v16 = vsel %vm185_vm7, %v184_v5, %v179_v13 }
  0xb7   :  { %v231_v11 = vrot.slane %v122_v8, %v1130_v62  ;;  %v98_v12 = vpop.xlane.xlu0 %97 }
  0xb8   :  { %v191_v15 = vrot.slane %v98_v12, %v1130_v62 }
  0xb9   :  { %v232_v17 = vsel %vm192_vm8, %v231_v11, %v227_v14 }
  0xba   :  { %v193_v19 = vsel %vm192_vm8, %v191_v15, %v186_v16  ;;  %v245_v24 = vpop.xlane.xlu1 %244  ;;  %v239_v15 = vld [vmem:[#allocation3] sm:$0x3] }
  0xbb   :  { %v234_v20 = vsel %vm233_vm9, %v232_v17, %v193_v19  ;;  %v242_v25 = vpop.xlane.xlu0 %241  ;;  %v311_v35 = vrot.slane %v245_v24, %v1104_v26 }
  0xbc   :  { %v236_v21 = vadd.f32 %v234_v20, %v74_v18  ;;  %v307_v37 = vrot.slane %v242_v25, %v1108_v31 }
  0xbe   :  { %238 = vst.msk [vmem:[#allocation2] sm:$0x3] %vm39_vm0, %v236_v21  ;;  %v269_v27 = vpop.xlane.xlu1 %268  ;;  %v312_v45 = vsel %vm150_vm2, %v311_v35, %v307_v37 }
  0xbf   :  { %v266_v28 = vpop.xlane.xlu0 %265  ;;  %v350_v38 = vrot.slane %v269_v27, %v1104_v26 }
  0xc0   :  { %v346_v39 = vrot.slane %v266_v28, %v1108_v31 }
  0xc2   :  { %v272_v30 = vpop.xlane.xlu1 %271  ;;  %v351_v46 = vsel %vm150_vm2, %v350_v38, %v346_v39 }
  0xc3   :  { %v248_v34 = vpop.xlane.xlu0 %247  ;;  %v355_v40 = vrot.slane %v272_v30, %v1106_v29 }
  0xc4   :  { %v316_v42 = vrot.slane %v248_v34, %v1106_v29 }
  0xc5   :  { %v389_v22 = vld [vmem:[#allocation2] sm:$0x3]  ;;  %v356_v58 = vsel %vm157_vm3, %v355_v40, %v351_v46 }
  0xc6   :  { %v390_v23 = vmul.f32 0.00390625, %v389_v22  ;;  %v275_v43 = vpop.xlane.xlu1 %274  ;;  %v317_v26 = vsel %vm157_vm3, %v316_v42, %v312_v45 }
  0xc7   :  { %v251_v44 = vpop.xlane.xlu0 %250  ;;  %v360_v47 = vrot.slane %v275_v43, %v1110_v32 }
  0xc8   :  { %785 = vmatmul.mubr.msk.f32.vlgmr.msra.gmra.mxu0 %vm406_vm10, %v390_v23  ;;  %v321_v57 = vrot.slane %v251_v44, %v1110_v32 }
  0xc9   :  { %813 = vmatprep.mubr.msk.f32.mxu0 %vm875_vm1, %v874_v48  ;;  %v361_v61 = vsel %vm164_vm4, %v360_v47, %v356_v58 }
  0xca   :  { %v278_v59 = vpop.xlane.xlu1 %277  ;;  %v322_v63 = vsel %vm164_vm4, %v321_v57, %v317_v26 }
  0xcb   :  { %v254_v31 = vpop.xlane.xlu0 %253  ;;  %v365_v60 = vrot.slane %v278_v59, %v1112_v33 }
  0xcc   :  { %v326_v29 = vrot.slane %v254_v31, %v1112_v33 }
  0xcd   :  { %v366_v3 = vsel %vm171_vm5, %v365_v60, %v361_v61 }
  0xce   :  { %v281_v2 = vpop.xlane.xlu1 %280  ;;  %v327_v4 = vsel %vm171_vm5, %v326_v29, %v322_v63 }
  0xcf   :  { %v257_v0 = vpop.xlane.xlu0 %256  ;;  %v370_v1 = vrot.slane %v281_v2, %v1115_v36 }
  0xd0   :  { %v331_v32 = vrot.slane %v257_v0, %v1115_v36 }
  0xd1   :  { %v371_v7 = vsel %vm178_vm6, %v370_v1, %v366_v3 }
  0xd2   :  { %v284_v5 = vpop.xlane.xlu1 %283  ;;  %v332_v33 = vsel %vm178_vm6, %v331_v32, %v327_v4 }
  0xd3   :  { %v260_v6 = vpop.xlane.xlu0 %259  ;;  %v375_v8 = vrot.slane %v284_v5, %v1119_v41 }
  0xd4   :  { %v336_v9 = vrot.slane %v260_v6, %v1119_v41  ;;  %v481_v41 = vld [vmem:[%s1224_s3] sm:$0xf] }
  0xd5   :  { %v376_v10 = vsel %vm185_vm7, %v375_v8, %v371_v7  ;;  %788 = vmatpush3.msk.msra.mxu1 %vm493_vm11, %v481_v41  ;;  %812 = vmatpush3.msk.msra.mxu0 %vm493_vm11, %v481_v41 }
  0xd6   :  { %v337_v11 = vsel %vm185_vm7, %v336_v9, %v332_v33  ;;  %v287_v12 = vpop.xlane.xlu1 %286  ;;  %792 = vmatprep.subr.mxu1 %v874_v48 }
  0xd7   :  { %v263_v36 = vpop.xlane.xlu0 %262  ;;  %v380_v13 = vrot.slane %v287_v12, %v1130_v62 }
  0xd8   :  { %v341_v14 = vrot.slane %v263_v36, %v1130_v62  ;;  %v738_v62 = vld [vmem:[%s1223_s2] ss:$0 sm:$0xff] }
  0xd9   :  { %v381_v16 = vsel %vm192_vm8, %v380_v13, %v376_v10 }
  0xda   :  { %v342_v17 = vsel %vm192_vm8, %v341_v14, %v337_v11 }
  0xdb   :  { %v382_v18 = vsel %vm233_vm9, %v381_v16, %v342_v17 }
  0xdc   :  { %v384_v19 = vmax.f32 %v239_v15, %v382_v18 }
  0xde   :  { %385 = vst.msk [vmem:[#allocation3] sm:$0x3] %vm39_vm0, %v384_v19 }
 0x188   :  { %v476_v20 = vpop.f32.mrf.mxu0 }
 0x189   :  { %v477_v21 = vadd.f32 %v738_v62, %v476_v20 }
 0x18a   :  { %v786_v22 = vpop.f32.mrf.mxu0 }
 0x18b   :  { %v480_v23 = vmax.f32 %v477_v21, 0.0 }
 0x18d   :  { %790 = vmatmul.mubr.msk.f32.vlgmr.msra.gmra.mxu1 %vm489_vm12, %v480_v23 }
 0x18e   :  { %793 = vmatpush3.msra.mxu1 %v1014_v49  ;;  %808 = vmatprep.mubr.msk.f32.mxu1 %vm875_vm1, %v874_v48  ;;  %v567_v49 = vld [vmem:[#allocation3] sm:$0x3] }
 0x18f   :  { %794 = vmatprep.subr.mxu1 %v874_v48 }
 0x190   :  { %795 = vmatpush3.msra.mxu1 %v1021_v50 }
 0x191   :  { %796 = vmatprep.subr.mxu1 %v874_v48 }
 0x192   :  { %797 = vmatpush3.msra.mxu1 %v1028_v51 }
 0x193   :  { %798 = vmatprep.subr.mxu1 %v874_v48 }
 0x194   :  { %799 = vmatpush3.msra.mxu1 %v1035_v52 }
 0x195   :  { %800 = vmatprep.subr.mxu1 %v874_v48 }
 0x196   :  { %801 = vmatpush3.msra.mxu1 %v1040_v53 }
 0x197   :  { %802 = vmatprep.subr.mxu1 %v874_v48 }
 0x198   :  { %803 = vmatpush3.msra.mxu1 %v1049_v54  ;;  %v740_v54 = vld [vmem:[%s1225_s4] ss:$0 sm:$0xff] }
 0x199   :  { %804 = vmatprep.subr.mxu1 %v874_v48 }
 0x19a   :  { %805 = vmatpush3.msra.mxu1 %v1058_v55 }
 0x19b   :  { %806 = vmatprep.subr.mxu1 %v874_v48 }
 0x19c   :  { %807 = vmatpush3.msra.mxu1 %v1065_v56 }
 0x19d   :  { %809 = vmatmul.mubr.msk.f32.vlgmr.msra.gmra.mxu1 %vm406_vm10, %v567_v49 }
 0x24d   :  { %v563_v50 = vpop.f32.mrf.mxu1 }
 0x24e   :  { %v564_v27 = vadd.f32 %v740_v54, %v563_v50 }
 0x24f   :  { %v791_v51 = vpop.f32.mrf.mxu1 }
 0x25d   :  { %v637_v52 = vpop.f32.mrf.mxu1 }
 0x25e   :  { %v638_v24 = vadd.f32 %v738_v62, %v637_v52 }
 0x25f   :  { %v810_v53 = vpop.f32.mrf.mxu1 }
 0x260   :  { %v641_v25 = vmax.f32 %v638_v24, 0.0 }
 0x262   :  { %814 = vmatmul.mubr.msk.f32.vlgmr.msra.gmra.mxu0 %vm489_vm12, %v641_v25 }
 0x322   :  { %v711_v55 = vpop.f32.mrf.mxu0 }
 0x323   :  { %v712_v48 = vadd.f32 %v740_v54, %v711_v55 }
 0x324   :  { %v815_v28 = vpop.f32.mrf.mxu0 }
 0x325   :  { %v715_v56 = vadd.f32 %v712_v48, %v564_v27 }
 0x327   :  { %v716_v30 = vsub.f32 0.0, %v715_v56 }
 0x329   :  { %v717_v34 = vmul.f32 1.442695, %v716_v30 }
 0x32b   :  { %823 = vpow2.f32 %v717_v34 }
 0x338   :  { %v824_v35 = vpop.eup %823 }
 0x339   :  { %v719_v37 = vadd.f32 1.0, %v824_v35 }
 0x33b   :  { %825 = vrcp.f32 %v719_v37 }
 0x348   :  { %v826_v38 = vpop.eup %825 }
 0x349   :  { %722 = vst.msk [vmem:[#allocation7] sm:$0x3] %vm39_vm0, %v826_v38 }
 0x34a   :  { %858 = shalt.err (!%p855_p9)
}
 0x34b   :  { %732 = dma.vmem_to_hbm [thread:$0]  %s730_s19, 32, %s1226_s5, [#allocation6]  }
 0x34c   :  { %869 = dma.done.wait [#allocation6], 32  }
 0x34d   :  { %870 = vsyncadd [#allocation6], 4294967264 }
 0x34e   :  { %736 = vsyncpa [#allocation5], 1 }
 0x34f   :  { %737 = vsyncpa [#allocation6], 1 }

</bundles_post_ra>
